<compile_context>
chip_gen: v5e
topology: v5e:2x2
jax: 0.10.0
libtpu: 0.0.40
codegen_flags: <defaults>
</compile_context>

<pallas_src>
import functools

import jax
import jax.numpy as jnp
from jax.experimental import pallas as pl
from jax.experimental.pallas import tpu as pltpu

TEXT_DIM = 768      # text-embedding-3-small dimension
SUBLANE_PAD = 8     # pad the single-row GEMV to a full sublane tile
LANE_PAD = 128      # pad num_classes to a lane-dense output width


# ---------------------------------------------------------------------------
# Pallas kernel: whole MLP (4 matmuls + bias + relu) in one call.
# ---------------------------------------------------------------------------
def mlp_kernel(text_ref, annot_ref, w1t_ref, w1a_ref, w2_ref, w3_ref, w4_ref,
               bias_ref, o_ref, *, hidden_size):
    H = hidden_size

    # fc1 as a split-K matmul (text half + annotator half) -- no concat needed.
    h = (jnp.dot(text_ref[...], w1t_ref[...], preferred_element_type=jnp.float32)
         + jnp.dot(annot_ref[...], w1a_ref[...], preferred_element_type=jnp.float32)
         + bias_ref[:, 0:H])
    h = jnp.maximum(h, 0.0).astype(jnp.bfloat16)

    # fc2
    h = (jnp.dot(h, w2_ref[...], preferred_element_type=jnp.float32)
         + bias_ref[:, H:3 * H])
    h = jnp.maximum(h, 0.0).astype(jnp.bfloat16)

    # fc3
    h = (jnp.dot(h, w3_ref[...], preferred_element_type=jnp.float32)
         + bias_ref[:, 3 * H:4 * H])
    h = jnp.maximum(h, 0.0).astype(jnp.bfloat16)

    # fc4 (lane-dense padded output, unmasked vst)
    o_ref[...] = (jnp.dot(h, w4_ref[...], preferred_element_type=jnp.float32)
                  + bias_ref[:, 4 * H:4 * H + LANE_PAD])


def annotator_mlp(text_emb, annot_emb, kernel_params, *, num_classes):
    """text_emb, annot_emb: (768,) f32 embedding vectors.

    Returns (num_classes,) f32 logits, matching the PyTorch forward.
    """
    w1t, w1a, w2, w3, w4p, bias_packed = kernel_params
    H = w1t.shape[1]

    # Pad the single embedding row to a full 8-sublane tile (rows 1..7 zero;
    # only row 0 is read back).
    def pad_rows(v):
        buf = jnp.zeros((SUBLANE_PAD, v.shape[-1]), jnp.bfloat16)
        return buf.at[0].set(v.astype(jnp.bfloat16))

    text = pad_rows(text_emb)
    annot = pad_rows(annot_emb)

    inputs = (text, annot, w1t, w1a, w2, w3, w4p, bias_packed)

    def full_spec(shape):
        # Single grid point -> index_map takes no grid args, whole array = one block.
        return pl.BlockSpec(shape, lambda: tuple(0 for _ in shape))

    flops = 2 * SUBLANE_PAD * (2 * TEXT_DIM * H + H * 2 * H + 2 * H * H
                               + H * LANE_PAD)
    bytes_accessed = (sum(int(a.size) * a.dtype.itemsize for a in inputs)
                      + SUBLANE_PAD * LANE_PAD * 4)

    out = pl.pallas_call(
        functools.partial(mlp_kernel, hidden_size=H),
        out_shape=jax.ShapeDtypeStruct((SUBLANE_PAD, LANE_PAD), jnp.float32),
        grid=(),
        in_specs=[full_spec(a.shape) for a in inputs],
        out_specs=full_spec((SUBLANE_PAD, LANE_PAD)),
        cost_estimate=pl.CostEstimate(flops=flops, transcendentals=0,
                                      bytes_accessed=bytes_accessed),
        # Well below physical VMEM on every generation (v7x: 64 MiB/TC) and
        # well above the actual double-buffered footprint.
        compiler_params=pltpu.CompilerParams(vmem_limit_bytes=16 << 20),
    )(*inputs)

    return out[0, :num_classes]


# ---------------------------------------------------------------------------
# Deterministic parameter init mimicking nn.Linear (U[-1/sqrt(fan_in), +...]).
# Weights are stored as (in_features, out_features) so the kernel computes
# x @ W + b (transpose of PyTorch's nn.Linear weight layout).
# ---------------------------------------------------------------------------
def init_linear(key, fan_in, fan_out):
    kw, kb = jax.random.split(key)
    bound = 1.0 / jnp.sqrt(jnp.float32(fan_in))
    w = jax.random.uniform(kw, (fan_in, fan_out), jnp.float32, -bound, bound)
    b = jax.random.uniform(kb, (fan_out,), jnp.float32, -bound, bound)
    return w, b


def make_params(key, hidden_size, num_classes, annotator_embedding_dim):
    in_dim = TEXT_DIM + annotator_embedding_dim
    k1, k2, k3, k4 = jax.random.split(key, 4)
    w1, b1 = init_linear(k1, in_dim, hidden_size)
    w2, b2 = init_linear(k2, hidden_size, hidden_size * 2)
    w3, b3 = init_linear(k3, hidden_size * 2, hidden_size)
    w4, b4 = init_linear(k4, hidden_size, num_classes)
    return (w1, b1, w2, b2, w3, b3, w4, b4)


def pack_params_for_kernel(params, num_classes):
    """bf16 weights, split fc1, lane-padded fc4, one packed f32 bias row."""
    w1, b1, w2, b2, w3, b3, w4, b4 = params
    H = w1.shape[1]
    assert num_classes <= LANE_PAD
    assert H % LANE_PAD == 0, "hidden_size must be a multiple of 128"

    w1t = w1[:TEXT_DIM].astype(jnp.bfloat16)           # (768, H)
    w1a = w1[TEXT_DIM:].astype(jnp.bfloat16)           # (annot_dim, H)
    w4p = jnp.zeros((H, LANE_PAD), jnp.bfloat16).at[:, :num_classes].set(
        w4.astype(jnp.bfloat16))
    b4p = jnp.zeros((LANE_PAD,), jnp.float32).at[:num_classes].set(b4)
    bias_packed = jnp.concatenate([b1, b2, b3, b4p])[None, :]   # (1, 4H+128)

    return (w1t, w1a, w2.astype(jnp.bfloat16), w3.astype(jnp.bfloat16),
            w4p, bias_packed)


# ---------------------------------------------------------------------------
# References
# ---------------------------------------------------------------------------
def reference_forward_f32(text_emb, annot_emb, params):
    """Pure-JAX f32 reference matching the PyTorch forward."""
    w1, b1, w2, b2, w3, b3, w4, b4 = params
    x = jnp.concatenate([text_emb, annot_emb], axis=-1)
    x = jnp.maximum(x @ w1 + b1, 0.0)
    x = jnp.maximum(x @ w2 + b2, 0.0)
    x = jnp.maximum(x @ w3 + b3, 0.0)
    return x @ w4 + b4


def reference_forward_bf16(text_emb, annot_emb, params):
    """Reference with the same bf16 weight/activation rounding as the kernel."""
    w1, b1, w2, b2, w3, b3, w4, b4 = params
    bf = lambda a: a.astype(jnp.bfloat16)
    x = bf(jnp.concatenate([text_emb, annot_emb], axis=-1))
    h = jnp.maximum(jnp.dot(x, bf(w1), preferred_element_type=jnp.float32) + b1, 0.0)
    h = jnp.maximum(jnp.dot(bf(h), bf(w2), preferred_element_type=jnp.float32) + b2, 0.0)
    h = jnp.maximum(jnp.dot(bf(h), bf(w3), preferred_element_type=jnp.float32) + b3, 0.0)
    return jnp.dot(bf(h), bf(w4), preferred_element_type=jnp.float32) + b4


if __name__ == "__main__":
    hidden_size = 128          # small, lane-aligned stand-in for the real 512
    num_classes = 10
    annotator_embedding_dim = 768

    key = jax.random.PRNGKey(0)
    kp, kt, ka = jax.random.split(key, 3)

    params = make_params(kp, hidden_size, num_classes, annotator_embedding_dim)
    kernel_params = pack_params_for_kernel(params, num_classes)

    # Stand-ins for the OpenAI text-embedding-3-small API responses.
    text_embeddings = jax.random.normal(kt, (TEXT_DIM,), jnp.float32)
    annotator_embeddings = jax.random.normal(ka, (annotator_embedding_dim,),
                                             jnp.float32)

    logits = annotator_mlp(text_embeddings, annotator_embeddings, kernel_params,
                           num_classes=num_classes)
    logits = jax.block_until_ready(logits)

    ref_bf16 = reference_forward_bf16(text_embeddings, annotator_embeddings, params)
    ref_f32 = reference_forward_f32(text_embeddings, annotator_embeddings, params)

    assert logits.shape == (num_classes,)
    # Strict check against the reference that uses identical bf16 rounding.
    assert jnp.allclose(logits, ref_bf16, atol=2e-2, rtol=2e-2), \
        f"mismatch vs bf16 reference (max abs err {jnp.max(jnp.abs(logits - ref_bf16))})"
    # Loose sanity check against the pure-f32 reference (bf16 rounding noise).
    assert jnp.allclose(logits, ref_f32, atol=2e-1, rtol=2e-1), \
        f"mismatch vs f32 reference (max abs err {jnp.max(jnp.abs(logits - ref_f32))})"

    print("KERNEL_OK")
</pallas_src>

<mosaic_0001>
module attributes {stable_mosaic.version = 11 : i64} {
  func.func @mlp_kernel(%arg0: memref<8x768xbf16, #tpu.memory_space<vmem>>, %arg1: memref<8x768xbf16, #tpu.memory_space<vmem>>, %arg2: memref<768x128xbf16, #tpu.memory_space<vmem>>, %arg3: memref<768x128xbf16, #tpu.memory_space<vmem>>, %arg4: memref<128x256xbf16, #tpu.memory_space<vmem>>, %arg5: memref<256x128xbf16, #tpu.memory_space<vmem>>, %arg6: memref<128x128xbf16, #tpu.memory_space<vmem>>, %arg7: memref<1x640xf32, #tpu.memory_space<vmem>>, %arg8: memref<8x128xf32, #tpu.memory_space<vmem>>) attributes {dimension_semantics = [], scalar_prefetch = 0 : i64, scratch_operands = 0 : i64, tpu.core_type = #tpu.core_type<tc>} {
    %c0 = arith.constant 0 : index
    %c0_0 = arith.constant 0 : index
    %0 = vector.load %arg0[%c0, %c0_0] : memref<8x768xbf16, #tpu.memory_space<vmem>>, vector<8x768xbf16>
    %c0_1 = arith.constant 0 : index
    %c0_2 = arith.constant 0 : index
    %1 = vector.load %arg2[%c0_1, %c0_2] : memref<768x128xbf16, #tpu.memory_space<vmem>>, vector<768x128xbf16>
    %cst = arith.constant dense<0.000000e+00> : vector<8x128xf32>
    %2 = tpu.matmul %0, %1, %cst {dimension_numbers = #tpu.dot_dimension_numbers<[1], [0], [0], [1], [0, 0, 1, 1], [], []>} : vector<8x768xbf16>, vector<768x128xbf16>, vector<8x128xf32> -> vector<8x128xf32>
    %c0_3 = arith.constant 0 : index
    %c0_4 = arith.constant 0 : index
    %3 = vector.load %arg1[%c0_3, %c0_4] : memref<8x768xbf16, #tpu.memory_space<vmem>>, vector<8x768xbf16>
    %c0_5 = arith.constant 0 : index
    %c0_6 = arith.constant 0 : index
    %4 = vector.load %arg3[%c0_5, %c0_6] : memref<768x128xbf16, #tpu.memory_space<vmem>>, vector<768x128xbf16>
    %cst_7 = arith.constant dense<0.000000e+00> : vector<8x128xf32>
    %5 = tpu.matmul %3, %4, %cst_7 {dimension_numbers = #tpu.dot_dimension_numbers<[1], [0], [0], [1], [0, 0, 1, 1], [], []>} : vector<8x768xbf16>, vector<768x128xbf16>, vector<8x128xf32> -> vector<8x128xf32>
    %6 = arith.addf %2, %5 : vector<8x128xf32>
    %c0_8 = arith.constant 0 : index
    %c0_9 = arith.constant 0 : index
    %7 = vector.load %arg7[%c0_8, %c0_9] : memref<1x640xf32, #tpu.memory_space<vmem>>, vector<1x128xf32>
    %8 = vector.broadcast %7 : vector<1x128xf32> to vector<8x128xf32>
    %9 = arith.addf %6, %8 : vector<8x128xf32>
    %cst_10 = arith.constant 0.000000e+00 : f32
    %10 = vector.broadcast %cst_10 : f32 to vector<8x128xf32>
    %11 = arith.maximumf %9, %10 : vector<8x128xf32>
    %12 = arith.truncf %11 : vector<8x128xf32> to vector<8x128xbf16>
    %c0_11 = arith.constant 0 : index
    %c0_12 = arith.constant 0 : index
    %13 = vector.load %arg4[%c0_11, %c0_12] : memref<128x256xbf16, #tpu.memory_space<vmem>>, vector<128x256xbf16>
    %cst_13 = arith.constant dense<0.000000e+00> : vector<8x256xf32>
    %14 = tpu.matmul %12, %13, %cst_13 {dimension_numbers = #tpu.dot_dimension_numbers<[1], [0], [0], [1], [0, 0, 1, 1], [], []>} : vector<8x128xbf16>, vector<128x256xbf16>, vector<8x256xf32> -> vector<8x256xf32>
    %c0_14 = arith.constant 0 : index
    %c128 = arith.constant 128 : index
    %15 = vector.load %arg7[%c0_14, %c128] : memref<1x640xf32, #tpu.memory_space<vmem>>, vector<1x256xf32>
    %16 = vector.broadcast %15 : vector<1x256xf32> to vector<8x256xf32>
    %17 = arith.addf %14, %16 : vector<8x256xf32>
    %cst_15 = arith.constant 0.000000e+00 : f32
    %18 = vector.broadcast %cst_15 : f32 to vector<8x256xf32>
    %19 = arith.maximumf %17, %18 : vector<8x256xf32>
    %20 = arith.truncf %19 : vector<8x256xf32> to vector<8x256xbf16>
    %c0_16 = arith.constant 0 : index
    %c0_17 = arith.constant 0 : index
    %21 = vector.load %arg5[%c0_16, %c0_17] : memref<256x128xbf16, #tpu.memory_space<vmem>>, vector<256x128xbf16>
    %cst_18 = arith.constant dense<0.000000e+00> : vector<8x128xf32>
    %22 = tpu.matmul %20, %21, %cst_18 {dimension_numbers = #tpu.dot_dimension_numbers<[1], [0], [0], [1], [0, 0, 1, 1], [], []>} : vector<8x256xbf16>, vector<256x128xbf16>, vector<8x128xf32> -> vector<8x128xf32>
    %c0_19 = arith.constant 0 : index
    %c384 = arith.constant 384 : index
    %23 = vector.load %arg7[%c0_19, %c384] : memref<1x640xf32, #tpu.memory_space<vmem>>, vector<1x128xf32>
    %24 = vector.broadcast %23 : vector<1x128xf32> to vector<8x128xf32>
    %25 = arith.addf %22, %24 : vector<8x128xf32>
    %cst_20 = arith.constant 0.000000e+00 : f32
    %26 = vector.broadcast %cst_20 : f32 to vector<8x128xf32>
    %27 = arith.maximumf %25, %26 : vector<8x128xf32>
    %28 = arith.truncf %27 : vector<8x128xf32> to vector<8x128xbf16>
    %c0_21 = arith.constant 0 : index
    %c0_22 = arith.constant 0 : index
    %29 = vector.load %arg6[%c0_21, %c0_22] : memref<128x128xbf16, #tpu.memory_space<vmem>>, vector<128x128xbf16>
    %cst_23 = arith.constant dense<0.000000e+00> : vector<8x128xf32>
    %30 = tpu.matmul %28, %29, %cst_23 {dimension_numbers = #tpu.dot_dimension_numbers<[1], [0], [0], [1], [0, 0, 1, 1], [], []>} : vector<8x128xbf16>, vector<128x128xbf16>, vector<8x128xf32> -> vector<8x128xf32>
    %c0_24 = arith.constant 0 : index
    %c512 = arith.constant 512 : index
    %31 = vector.load %arg7[%c0_24, %c512] : memref<1x640xf32, #tpu.memory_space<vmem>>, vector<1x128xf32>
    %32 = vector.broadcast %31 : vector<1x128xf32> to vector<8x128xf32>
    %33 = arith.addf %30, %32 : vector<8x128xf32>
    %c0_25 = arith.constant 0 : index
    %c0_26 = arith.constant 0 : index
    %34 = vector.load %arg8[%c0_25, %c0_26] : memref<8x128xf32, #tpu.memory_space<vmem>>, vector<8x128xf32>
    tpu.vector_store %arg8[%c0_25, %c0_26], %33 {strides = array<i32>} : memref<8x128xf32, #tpu.memory_space<vmem>>, vector<8x128xf32>,
    return
  }
}

</mosaic_0001>

<bundles_post_ra>
// kernel: tpu_custom_call.1
= control target key start
LH: loop header
LB: loop body
LE: loop exit
PB: predicated region body
PF: predicated region fallthrough
CT: control target
= control target key end

     0   :  { %13 = vsyncpa [#allocation3], 0  ;;  %s2516_s0 = inlined_call_operand.hbm [shape: bf16[8,768], index: 0, kind: input, shape index: {}]   ;;  %s2517_s1 = inlined_call_operand.hbm [shape: bf16[8,768], index: 1, kind: input, shape index: {}]   ;;  %s2518_s2 = inlined_call_operand.hbm [shape: bf16[768,128], index: 2, kind: input, shape index: {}]   ;;  %s2519_s3 = inlined_call_operand.hbm [shape: bf16[768,128], index: 3, kind: input, shape index: {}]   ;;  %s2520_s4 = inlined_call_operand.hbm [shape: bf16[128,256], index: 4, kind: input, shape index: {}]   ;;  %s2521_s5 = inlined_call_operand.hbm [shape: bf16[256,128], index: 5, kind: input, shape index: {}]   ;;  %s2522_s6 = inlined_call_operand.hbm [shape: bf16[128,128], index: 6, kind: input, shape index: {}]   ;;  %s2523_s7 = inlined_call_operand.vmem [shape: f32[1,640], index: 7, kind: input, shape index: {}]   ;;  %s2524_s8 = inlined_call_operand.hbm [shape: f32[8,128], index: 8, kind: output, shape index: {}]  }
   0x1   :  { %14 = vsyncpa [#allocation6], 0 }
   0x2   :  { %15 = vsyncpa [#allocation9], 0 }
   0x3   :  { %16 = vsyncpa [#allocation12], 0  ;;  %s34_s29 = sshll.u32 %s2517_s1, 4  ;;  %s35_s29 = int_to_ptr.hbm [resolvable:$true] %s34_s29 }
   0x4   :  { %17 = vsyncpa [#allocation4], 0  ;;  %s2405_s30 = smov [#allocation5]   ;;  %s57_s12 = sshll.u32 %s2519_s3, 4  ;;  %s58_s12 = int_to_ptr.hbm [resolvable:$true] %s57_s12 }
   0x5   :  { %s36_s9 = sshll.u32 %s2405_s30, 4  ;;  %s2406_s13 = smov [#allocation8]   ;;  %s37_s9 = int_to_ptr.vmem [resolvable:$true] %s36_s9 }
   0x6   :  { %39 = dma.hbm_to_vmem [thread:$0]  %s35_s29, 384, %s37_s9, [#allocation6]  }
   0x7   :  { %s59_s14 = sshll.u32 %s2406_s13, 4  ;;  %s83_s17 = sshll.u32 %s2521_s5, 4  ;;  %s60_s14 = int_to_ptr.vmem [resolvable:$true] %s59_s14  ;;  %s84_s17 = int_to_ptr.hbm [resolvable:$true] %s83_s17 }
   0x8   :  { %s2407_s1 = smov 64   ;;  %s2408_s18 = smov 4  }
   0x9   :  { %65 = dma.hbm_to_vmem [thread:$0]  %s58_s12, 6144, %s60_s14, [#allocation9], %s2407_s1, %s2407_s1, %s2408_s18  }
   0xa   :  { %s23_s21 = sshll.u32 %s2516_s0, 4  ;;  %s2409_s3 = smov [#allocation11]   ;;  %s24_s21 = int_to_ptr.hbm [resolvable:$true] %s23_s21 }
   0xb   :  { %s85_s22 = sshll.u32 %s2409_s3, 4  ;;  %s2410_s5 = smov [#allocation2]   ;;  %s86_s22 = int_to_ptr.vmem [resolvable:$true] %s85_s22 }
   0xc   :  { %91 = dma.hbm_to_vmem [thread:$0]  %s84_s17, 2048, %s86_s22, [#allocation12], %s2407_s1, %s2407_s1, %s2408_s18  }
   0xd   :  { %s25_s23 = sshll.u32 %s2410_s5, 4  ;;  %s44_s26 = sshll.u32 %s2518_s2, 4  ;;  %s26_s23 = int_to_ptr.vmem [resolvable:$true] %s25_s23  ;;  %s45_s26 = int_to_ptr.hbm [resolvable:$true] %s44_s26 }
   0xe   :  { %28 = dma.hbm_to_vmem [thread:$0]  %s24_s21, 384, %s26_s23, [#allocation3]  }
   0xf   :  { %s70_s0 = sshll.u32 %s2520_s4, 4  ;;  %s2411_s29 = smov [#allocation7]   ;;  %s71_s0 = int_to_ptr.hbm [resolvable:$true] %s70_s0 }
  0x10   :  { %s46_s30 = sshll.u32 %s2411_s29, 4  ;;  %s2412_s9 = smov [#allocation10]   ;;  %s47_s30 = int_to_ptr.vmem [resolvable:$true] %s46_s30 }
  0x11   :  { %52 = dma.hbm_to_vmem [thread:$0]  %s45_s26, 6144, %s47_s30, [#allocation6], %s2407_s1, %s2407_s1, %s2408_s18  }
  0x12   :  { %s72_s10 = sshll.u32 %s2412_s9, 4  ;;  %s2413_s11 = smov 128   ;;  %s73_s10 = int_to_ptr.vmem [resolvable:$true] %s72_s10 }
  0x13   :  { %s2414_s2 = smov 8   ;;  %s96_s14 = sshll.u32 %s2522_s6, 4  ;;  %s97_s14 = int_to_ptr.hbm [resolvable:$true] %s96_s14 }
  0x14   :  { %78 = dma.hbm_to_vmem [thread:$0]  %s71_s0, 2048, %s73_s10, [#allocation9], %s2413_s11, %s2413_s11, %s2414_s2  }
  0x15   :  { %s2415_s4 = smov [#allocation13]  }
  0x16   :  { %s98_s15 = sshll.u32 %s2415_s4, 4  ;;  %s99_s15 = int_to_ptr.vmem [resolvable:$true] %s98_s15 }
  0x17   :  { %104 = dma.hbm_to_vmem [thread:$0]  %s97_s14, 1024, %s99_s15, [#allocation12], %s2407_s1, %s2407_s1, %s2408_s18  }
  0x18   :  { %2395 = dma.done.wait [#allocation3], 384  }
  0x19   :  { %2396 = vsyncadd [#allocation3], 4294966912 }
  0x1a   :  { %2397 = dma.done.wait [#allocation6], 6528  }
  0x1b   :  { %2398 = vsyncadd [#allocation6], 4294960768 }
  0x1c   :  { %2399 = dma.done.wait [#allocation9], 8192  }
  0x1d   :  { %2400 = vsyncadd [#allocation9], 4294959104 }
  0x1e   :  { %2401 = dma.done.wait [#allocation12], 3072  }
  0x1f   :  { %2402 = vsyncadd [#allocation12], 4294964224  ;;  %v2107_v0 = vld [vmem:[#allocation8 + $0x38] sm:$0xff]  ;;  %v2106_v4 = vld [vmem:[#allocation8 + $0x30] sm:$0xff]  ;;  %s2416_s3 = smov [#allocation14]   ;;  %s1495_s24 = sshll.u32 %s2524_s8, 4  ;;  %s1496_s24 = int_to_ptr.hbm [resolvable:$true] %s1495_s24 }
  0x20   :  { %v2115_v1 = vld [vmem:[#allocation8 + $0x78] sm:$0xff]  ;;  %642 = vmatpush.bf16.msra.mxu0 %v2107_v0  ;;  %v2114_v5 = vld [vmem:[#allocation8 + $0x70] sm:$0xff]  ;;  %v2105_v8 = vld [vmem:[#allocation8 + $0x28] sm:$0xff]  ;;  %s1493_s22 = sshll.u32 %s2416_s3, 4  ;;  %s1494_s22 = int_to_ptr.vmem [resolvable:$true] %s1493_s22 }
  0x21   :  { %v2123_v2 = vld [vmem:[#allocation8 + $0xb8] sm:$0xff]  ;;  %655 = vmatpush.bf16.msra.mxu1 %v2115_v1  ;;  %v2122_v6 = vld [vmem:[#allocation8 + $0xb0] sm:$0xff]  ;;  %v2113_v9 = vld [vmem:[#allocation8 + $0x68] sm:$0xff] }
  0x22   :  { %v2131_v3 = vld [vmem:[#allocation8 + $0xf8] sm:$0xff]  ;;  %668 = vmatpush.bf16.msra.mxu2 %v2123_v2  ;;  %v2130_v7 = vld [vmem:[#allocation8 + $0xf0] sm:$0xff]  ;;  %v2121_v10 = vld [vmem:[#allocation8 + $0xa8] sm:$0xff] }
  0x23   :  { %681 = vmatpush.bf16.msra.mxu3 %v2131_v3  ;;  %v2129_v11 = vld [vmem:[#allocation8 + $0xe8] sm:$0xff]  ;;  %v2104_v12 = vld [vmem:[#allocation8 + $0x20] sm:$0xff]  ;;  %v2103_v16 = vld [vmem:[#allocation8 + $0x18] sm:$0xff] }
  0x24   :  { %643 = vmatpush.bf16.msra.mxu0 %v2106_v4  ;;  %v2112_v13 = vld [vmem:[#allocation8 + $0x60] sm:$0xff]  ;;  %v2111_v17 = vld [vmem:[#allocation8 + $0x58] sm:$0xff]  ;;  %v2102_v20 = vld [vmem:[#allocation8 + $0x10] sm:$0xff] }
  0x25   :  { %656 = vmatpush.bf16.msra.mxu1 %v2114_v5  ;;  %v2120_v14 = vld [vmem:[#allocation8 + $0xa0] sm:$0xff]  ;;  %v2119_v18 = vld [vmem:[#allocation8 + $0x98] sm:$0xff]  ;;  %v2110_v21 = vld [vmem:[#allocation8 + $0x50] sm:$0xff] }
  0x26   :  { %669 = vmatpush.bf16.msra.mxu2 %v2122_v6  ;;  %v2128_v15 = vld [vmem:[#allocation8 + $0xe0] sm:$0xff]  ;;  %v2127_v19 = vld [vmem:[#allocation8 + $0xd8] sm:$0xff]  ;;  %v2118_v22 = vld [vmem:[#allocation8 + $0x90] sm:$0xff] }
  0x27   :  { %682 = vmatpush.bf16.msra.mxu3 %v2130_v7  ;;  %v2126_v23 = vld [vmem:[#allocation8 + $0xd0] sm:$0xff]  ;;  %v2101_v24 = vld [vmem:[#allocation8 + $0x8] sm:$0xff]  ;;  %v2100_v30 = vld [vmem:[#allocation8] sm:$0xff] }
  0x28   :  { %644 = vmatpush.bf16.msra.mxu0 %v2105_v8  ;;  %v2109_v25 = vld [vmem:[#allocation8 + $0x48] sm:$0xff]  ;;  %v235_v28 = vld [vmem:[#allocation5 + $0x8] sm:$0xff]  ;;  %v2108_v31 = vld [vmem:[#allocation8 + $0x40] sm:$0xff] }
  0x29   :  { %657 = vmatpush.bf16.msra.mxu1 %v2113_v9  ;;  %v2117_v26 = vld [vmem:[#allocation8 + $0x88] sm:$0xff]  ;;  %v338_v32 = vunpack.c.l.b16 %v235_v28  ;;  %v2116_v34 = vld [vmem:[#allocation8 + $0x80] sm:$0xff]  ;;  %v339_v36 = vunpack.c.h.b16 %v235_v28  ;;  %v2139_v38 = vld [vmem:[#allocation8 + $0x138] sm:$0xff] }
  0x2a   :  { %670 = vmatpush.bf16.msra.mxu2 %v2121_v10  ;;  %v2125_v27 = vld [vmem:[#allocation8 + $0xc8] sm:$0xff]  ;;  %v2124_v35 = vld [vmem:[#allocation8 + $0xc0] sm:$0xff]  ;;  %v2147_v39 = vld [vmem:[#allocation8 + $0x178] sm:$0xff] }
  0x2b   :  { %683 = vmatpush.bf16.msra.mxu3 %v2129_v11  ;;  %v234_v29 = vld [vmem:[#allocation5] sm:$0xff]  ;;  %v2059_v40 = vld [vmem:[#allocation7 + $0x38] sm:$0xff]  ;;  %v344_v42 = vpack.c.b16 %v338_v32, %v338_v32  ;;  %v345_v44 = vpack.c.b16 %v339_v36, %v339_v36  ;;  %v2138_v46 = vld [vmem:[#allocation8 + $0x130] sm:$0xff] }
  0x2c   :  { %645 = vmatpush.bf16.msra.mxu0 %v2104_v12  ;;  %v336_v33 = vunpack.c.l.b16 %v234_v29  ;;  %v337_v37 = vunpack.c.h.b16 %v234_v29  ;;  %v2067_v41 = vld [vmem:[#allocation7 + $0x78] sm:$0xff]  ;;  %v2146_v47 = vld [vmem:[#allocation8 + $0x170] sm:$0xff]  ;;  %v2137_v50 = vld [vmem:[#allocation8 + $0x128] sm:$0xff] }
  0x2d   :  { %658 = vmatpush.bf16.msra.mxu1 %v2112_v13  ;;  %v2058_v48 = vld [vmem:[#allocation7 + $0x30] sm:$0xff]  ;;  %v2145_v51 = vld [vmem:[#allocation8 + $0x168] sm:$0xff]  ;;  %v2136_v54 = vld [vmem:[#allocation8 + $0x120] sm:$0xff] }
  0x2e   :  { %671 = vmatpush.bf16.msra.mxu2 %v2120_v14  ;;  %v342_v43 = vpack.c.b16 %v336_v33, %v336_v33  ;;  %v343_v45 = vpack.c.b16 %v337_v37, %v337_v37  ;;  %v2066_v49 = vld [vmem:[#allocation7 + $0x70] sm:$0xff]  ;;  %v2057_v52 = vld [vmem:[#allocation7 + $0x28] sm:$0xff]  ;;  %v2144_v55 = vld [vmem:[#allocation8 + $0x160] sm:$0xff] }
  0x2f   :  { %684 = vmatpush.bf16.msra.mxu3 %v2128_v15  ;;  %v2065_v53 = vld [vmem:[#allocation7 + $0x68] sm:$0xff]  ;;  %v2056_v56 = vld [vmem:[#allocation7 + $0x20] sm:$0xff]  ;;  %v2135_v58 = vld [vmem:[#allocation8 + $0x118] sm:$0xff] }
  0x30   :  { %646 = vmatpush.bf16.msra.mxu0 %v2103_v16  ;;  %v2064_v57 = vld [vmem:[#allocation7 + $0x60] sm:$0xff]  ;;  %v2143_v59 = vld [vmem:[#allocation8 + $0x158] sm:$0xff]  ;;  %v2134_v62 = vld [vmem:[#allocation8 + $0x110] sm:$0xff] }
  0x31   :  { %659 = vmatpush.bf16.msra.mxu1 %v2111_v17  ;;  %v2055_v60 = vld [vmem:[#allocation7 + $0x18] sm:$0xff]  ;;  %v2142_v63 = vld [vmem:[#allocation8 + $0x150] sm:$0xff]  ;;  %v2133_v2 = vld [vmem:[#allocation8 + $0x108] sm:$0xff] }
  0x32   :  { %672 = vmatpush.bf16.msra.mxu2 %v2119_v18  ;;  %v2063_v61 = vld [vmem:[#allocation7 + $0x58] sm:$0xff]  ;;  %v2054_v0 = vld [vmem:[#allocation7 + $0x10] sm:$0xff]  ;;  %v2141_v3 = vld [vmem:[#allocation8 + $0x148] sm:$0xff] }
  0x33   :  { %685 = vmatpush.bf16.msra.mxu3 %v2127_v19  ;;  %v2062_v1 = vld [vmem:[#allocation7 + $0x50] sm:$0xff]  ;;  %v2053_v4 = vld [vmem:[#allocation7 + $0x8] sm:$0xff]  ;;  %v236_v7 = vld [vmem:[#allocation5 + $0x10] sm:$0xff] }
  0x34   :  { %647 = vmatpush.bf16.msra.mxu0 %v2102_v20  ;;  %v2061_v5 = vld [vmem:[#allocation7 + $0x48] sm:$0xff]  ;;  %v135_v6 = vld [vmem:[#allocation2] sm:$0xff]  ;;  %v2132_v8 = vld [vmem:[#allocation8 + $0x100] sm:$0xff]  ;;  %v340_v11 = vunpack.c.l.b16 %v236_v7  ;;  %v341_v15 = vunpack.c.h.b16 %v236_v7 }
  0x35   :  { %660 = vmatpush.bf16.msra.mxu1 %v2110_v21  ;;  %v2140_v9 = vld [vmem:[#allocation8 + $0x140] sm:$0xff]  ;;  %v723_v10 = vunpack.c.l.b16 %v135_v6  ;;  %v724_v14 = vunpack.c.h.b16 %v135_v6  ;;  %v2075_v16 = vld [vmem:[#allocation7 + $0xb8] sm:$0xff]  ;;  %v2073_v28 = vld [vmem:[#allocation7 + $0xa8] sm:$0xff] }
  0x36   :  { %673 = vmatpush.bf16.msra.mxu2 %v2118_v22  ;;  %v2052_v12 = vld [vmem:[#allocation7] sm:$0xff]  ;;  %v2083_v17 = vld [vmem:[#allocation7 + $0xf8] sm:$0xff]  ;;  %v346_v21 = vpack.c.b16 %v340_v11, %v340_v11  ;;  %v2081_v29 = vld [vmem:[#allocation7 + $0xe8] sm:$0xff] }
  0x37   :  { %686 = vmatpush.bf16.msra.mxu3 %v2126_v23  ;;  %v2060_v13 = vld [vmem:[#allocation7 + $0x40] sm:$0xff]  ;;  %v2091_v18 = vld [vmem:[#allocation7 + $0x138] sm:$0xff]  ;;  %v729_v20 = vpack.c.b16 %v723_v10, %v723_v10  ;;  %v730_v22 = vpack.c.b16 %v724_v14, %v724_v14  ;;  %v347_v23 = vpack.c.b16 %v341_v15, %v341_v15  ;;  %v2161_v11 = vld [vmem:[#allocation10 + $0x64] sm:$0xf0] }
  0x38   :  { %648 = vmatpush.bf16.msra.mxu0 %v2101_v24  ;;  %v2099_v19 = vld [vmem:[#allocation7 + $0x178] sm:$0xff]  ;;  %v2074_v24 = vld [vmem:[#allocation7 + $0xb0] sm:$0xff]  ;;  %v2072_v32 = vld [vmem:[#allocation7 + $0xa0] sm:$0xff] }
  0x39   :  { %661 = vmatpush.bf16.msra.mxu1 %v2109_v25  ;;  %v2082_v25 = vld [vmem:[#allocation7 + $0xf0] sm:$0xff]  ;;  %v2080_v33 = vld [vmem:[#allocation7 + $0xe0] sm:$0xff]  ;;  %v2071_v36 = vld [vmem:[#allocation7 + $0x98] sm:$0xff] }
  0x3a   :  { %674 = vmatpush.bf16.msra.mxu2 %v2117_v26  ;;  %v2090_v26 = vld [vmem:[#allocation7 + $0x130] sm:$0xff]  ;;  %v2079_v37 = vld [vmem:[#allocation7 + $0xd8] sm:$0xff]  ;;  %v1942_v10 = vld [vmem:[#allocation10 + $0x60] sm:$0xf] }
  0x3b   :  { %687 = vmatpush.bf16.msra.mxu3 %v2125_v27  ;;  %v2098_v27 = vld [vmem:[#allocation7 + $0x170] sm:$0xff]  ;;  %v1952_v7 = vld [vmem:[#allocation10 + $0x78] sm:$0xf0]  ;;  %v1944_v14 = vld [vmem:[#allocation10 + $0x68] sm:$0xf0] }
  0x3c   :  { %649 = vmatpush.bf16.msra.mxu0 %v2100_v30  ;;  %v2089_v30 = vld [vmem:[#allocation7 + $0x128] sm:$0xff]  ;;  %v1934_v15 = vld [vmem:[#allocation10 + $0x50] sm:$0xf] }
  0x3d   :  { %662 = vmatpush.bf16.msra.mxu1 %v2108_v31  ;;  %v2097_v31 = vld [vmem:[#allocation7 + $0x168] sm:$0xff] }
  0x3e   :  { %675 = vmatpush.bf16.msra.mxu2 %v2116_v34  ;;  %v2088_v34 = vld [vmem:[#allocation7 + $0x120] sm:$0xff] }
  0x3f   :  { %688 = vmatpush.bf16.msra.mxu3 %v2124_v35  ;;  %650 = vmatmul.bf16.vlgmr.msra.gmra.mxu0 %v342_v43  ;;  %v2096_v35 = vld [vmem:[#allocation7 + $0x160] sm:$0xff]  ;;  %v2094_v43 = vld [vmem:[#allocation7 + $0x150] sm:$0xff] }
  0x40   :  { %694 = vmatpush.bf16.msrb.mxu0 %v2139_v38  ;;  %663 = vmatmul.bf16.vlgmr.msra.gmra.mxu1 %v343_v45  ;;  %v2087_v38 = vld [vmem:[#allocation7 + $0x118] sm:$0xff]  ;;  %v2077_v45 = vld [vmem:[#allocation7 + $0xc8] sm:$0xff] }
  0x41   :  { %707 = vmatpush.bf16.msrb.mxu1 %v2147_v39  ;;  %676 = vmatmul.bf16.vlgmr.msra.gmra.mxu2 %v344_v42  ;;  %v2095_v39 = vld [vmem:[#allocation7 + $0x158] sm:$0xff]  ;;  %v2086_v42 = vld [vmem:[#allocation7 + $0x110] sm:$0xff] }
  0x42   :  { %1029 = vmatpush.bf16.msrb.mxu2 %v2059_v40  ;;  %689 = vmatmul.bf16.vlgmr.msra.gmra.mxu3 %v345_v44  ;;  %v2070_v40 = vld [vmem:[#allocation7 + $0x90] sm:$0xff]  ;;  %v2069_v44 = vld [vmem:[#allocation7 + $0x88] sm:$0xff] }
  0x43   :  { %1042 = vmatpush.bf16.msrb.mxu3 %v2067_v41  ;;  %v2078_v41 = vld [vmem:[#allocation7 + $0xd0] sm:$0xff] }
  0x44   :  { %695 = vmatpush.bf16.msrb.mxu0 %v2138_v46  ;;  %v136_v46 = vld [vmem:[#allocation2 + $0x8] sm:$0xff] }
  0x45   :  { %708 = vmatpush.bf16.msrb.mxu1 %v2146_v47  ;;  %v2085_v47 = vld [vmem:[#allocation7 + $0x108] sm:$0xff] }
  0x46   :  { %1030 = vmatpush.bf16.msrb.mxu2 %v2058_v48  ;;  %v2093_v48 = vld [vmem:[#allocation7 + $0x148] sm:$0xff] }
  0x47   :  { %1043 = vmatpush.bf16.msrb.mxu3 %v2066_v49  ;;  %v137_v49 = vld [vmem:[#allocation2 + $0x10] sm:$0xff] }
  0x48   :  { %696 = vmatpush.bf16.msrb.mxu0 %v2137_v50  ;;  %v725_v50 = vunpack.c.l.b16 %v136_v46 }
  0x49   :  { %709 = vmatpush.bf16.msrb.mxu1 %v2145_v51  ;;  %v726_v51 = vunpack.c.h.b16 %v136_v46  ;;  %v2151_v46 = vld [vmem:[#allocation10 + $0x14] sm:$0xf0] }
  0x4a   :  { %1031 = vmatpush.bf16.msrb.mxu2 %v2057_v52  ;;  %v2068_v52 = vld [vmem:[#allocation7 + $0x80] sm:$0xff] }
  0x4b   :  { %1044 = vmatpush.bf16.msrb.mxu3 %v2065_v53  ;;  %v2076_v53 = vld [vmem:[#allocation7 + $0xc0] sm:$0xff] }
  0x4c   :  { %697 = vmatpush.bf16.msrb.mxu0 %v2136_v54  ;;  %v727_v54 = vunpack.c.l.b16 %v137_v49 }
  0x4d   :  { %710 = vmatpush.bf16.msrb.mxu1 %v2144_v55  ;;  %v728_v55 = vunpack.c.h.b16 %v137_v49 }
  0x4e   :  { %1032 = vmatpush.bf16.msrb.mxu2 %v2056_v56  ;;  %v2084_v56 = vld [vmem:[#allocation7 + $0x100] sm:$0xff] }
  0x4f   :  { %1045 = vmatpush.bf16.msrb.mxu3 %v2064_v57  ;;  %v2092_v57 = vld [vmem:[#allocation7 + $0x140] sm:$0xff] }
  0x50   :  { %698 = vmatpush.bf16.msrb.mxu0 %v2135_v58  ;;  %v731_v58 = vpack.c.b16 %v725_v50, %v725_v50  ;;  %v1904_v50 = vld [vmem:[#allocation10 + $0x18] sm:$0xf0] }
  0x51   :  { %711 = vmatpush.bf16.msrb.mxu1 %v2143_v59  ;;  %v732_v59 = vpack.c.b16 %v726_v51, %v726_v51 }
  0x52   :  { %1033 = vmatpush.bf16.msrb.mxu2 %v2055_v60  ;;  %v733_v60 = vpack.c.b16 %v727_v54, %v727_v54 }
  0x53   :  { %1046 = vmatpush.bf16.msrb.mxu3 %v2063_v61  ;;  %v734_v61 = vpack.c.b16 %v728_v55, %v728_v55 }
  0x54   :  { %699 = vmatpush.bf16.msrb.mxu0 %v2134_v62 }
  0x55   :  { %712 = vmatpush.bf16.msrb.mxu1 %v2142_v63 }
  0x56   :  { %1034 = vmatpush.bf16.msrb.mxu2 %v2054_v0 }
  0x57   :  { %1047 = vmatpush.bf16.msrb.mxu3 %v2062_v1 }
  0x58   :  { %700 = vmatpush.bf16.msrb.mxu0 %v2133_v2  ;;  %v1950_v2 = vld [vmem:[#allocation10 + $0x70] sm:$0xf] }
  0x59   :  { %713 = vmatpush.bf16.msrb.mxu1 %v2141_v3  ;;  %v2163_v3 = vld [vmem:[#allocation10 + $0x74] sm:$0xf0] }
  0x5a   :  { %1035 = vmatpush.bf16.msrb.mxu2 %v2053_v4  ;;  %v2162_v4 = vld [vmem:[#allocation10 + $0x74] sm:$0xf]  ;;  %v1951_v6 = vor.u32 %v2163_v3, %v1950_v2  ;;  %v2171_v3 = vld [vmem:[#allocation11 + $0x38] sm:$0xff] }
  0x5b   :  { %1048 = vmatpush.bf16.msrb.mxu3 %v2061_v5 }
  0x5c   :  { %701 = vmatpush.bf16.msrb.mxu0 %v2132_v8 }
  0x5d   :  { %714 = vmatpush.bf16.msrb.mxu1 %v2140_v9  ;;  %v1955_v9 = vor.u32 %v2162_v4, %v1952_v7  ;;  %v2179_v4 = vld [vmem:[#allocation11 + $0x78] sm:$0xff] }
  0x5e   :  { %1036 = vmatpush.bf16.msrb.mxu2 %v2052_v12  ;;  %v2160_v12 = vld [vmem:[#allocation10 + $0x64] sm:$0xf] }
  0x5f   :  { %1049 = vmatpush.bf16.msrb.mxu3 %v2060_v13  ;;  %702 = vmatmul.bf16.vlgmr.msrb.gmra.mxu0 %v346_v21  ;;  %v1943_v13 = vor.u32 %v2161_v11, %v1942_v10  ;;  %v2168_v11 = vld [vmem:[#allocation11 + $0x20] sm:$0xff] }
  0x60   :  { %1055 = vmatpush.bf16.msra.mxu0 %v2075_v16  ;;  %715 = vmatmul.bf16.vlgmr.msrb.gmra.mxu1 %v347_v23  ;;  %v2159_v16 = vld [vmem:[#allocation10 + $0x54] sm:$0xf0] }
  0x61   :  { %1068 = vmatpush.bf16.msra.mxu1 %v2083_v17  ;;  %1037 = vmatmul.bf16.vlgmr.msrb.gmra.mxu2 %v729_v20  ;;  %v1936_v20 = vld [vmem:[#allocation10 + $0x58] sm:$0xf0] }
  0x62   :  { %1081 = vmatpush.bf16.msra.mxu2 %v2091_v18  ;;  %1050 = vmatmul.bf16.vlgmr.msrb.gmra.mxu3 %v730_v22  ;;  %v1947_v18 = vor.u32 %v2160_v12, %v1944_v14  ;;  %v1935_v22 = vor.u32 %v2159_v16, %v1934_v15  ;;  %v2167_v15 = vld [vmem:[#allocation11 + $0x18] sm:$0xff] }
  0x63   :  { %1094 = vmatpush.bf16.msra.mxu3 %v2099_v19  ;;  %v2158_v19 = vld [vmem:[#allocation10 + $0x54] sm:$0xf]  ;;  %v2175_v16 = vld [vmem:[#allocation11 + $0x58] sm:$0xff] }
  0x64   :  { %1056 = vmatpush.bf16.msra.mxu0 %v2074_v24  ;;  %v1939_v23 = vor.u32 %v2158_v19, %v1936_v20  ;;  %v1926_v24 = vld [vmem:[#allocation10 + $0x40] sm:$0xf]  ;;  %v2174_v19 = vld [vmem:[#allocation11 + $0x50] sm:$0xff] }
  0x65   :  { %1069 = vmatpush.bf16.msra.mxu1 %v2082_v25  ;;  %v2157_v25 = vld [vmem:[#allocation10 + $0x44] sm:$0xf0] }
  0x66   :  { %1082 = vmatpush.bf16.msra.mxu2 %v2090_v26  ;;  %v2156_v26 = vld [vmem:[#allocation10 + $0x44] sm:$0xf] }
  0x67   :  { %1095 = vmatpush.bf16.msra.mxu3 %v2098_v27  ;;  %v1928_v27 = vld [vmem:[#allocation10 + $0x48] sm:$0xf0] }
  0x68   :  { %1057 = vmatpush.bf16.msra.mxu0 %v2073_v28  ;;  %v1927_v28 = vor.u32 %v2157_v25, %v1926_v24  ;;  %v2200_v24 = vld [vmem:[%s2523_s7] ss:$0 sm:$0xff] }
  0x69   :  { %1070 = vmatpush.bf16.msra.mxu1 %v2081_v29  ;;  %v1931_v29 = vor.u32 %v2156_v26, %v1928_v27 }
  0x6a   :  { %1083 = vmatpush.bf16.msra.mxu2 %v2089_v30  ;;  %v1918_v30 = vld [vmem:[#allocation10 + $0x30] sm:$0xf] }
  0x6b   :  { %1096 = vmatpush.bf16.msra.mxu3 %v2097_v31  ;;  %v2155_v31 = vld [vmem:[#allocation10 + $0x34] sm:$0xf0] }
  0x6c   :  { %1058 = vmatpush.bf16.msra.mxu0 %v2072_v32  ;;  %v2154_v32 = vld [vmem:[#allocation10 + $0x34] sm:$0xf] }
  0x6d   :  { %1071 = vmatpush.bf16.msra.mxu1 %v2080_v33  ;;  %v1919_v33 = vor.u32 %v2155_v31, %v1918_v30 }
  0x6e   :  { %1084 = vmatpush.bf16.msra.mxu2 %v2088_v34  ;;  %v1920_v34 = vld [vmem:[#allocation10 + $0x38] sm:$0xf0] }
  0x6f   :  { %1097 = vmatpush.bf16.msra.mxu3 %v2096_v35  ;;  %v1923_v35 = vor.u32 %v2154_v32, %v1920_v34  ;;  %v2173_v34 = vld [vmem:[#allocation11 + $0x48] sm:$0xff] }
  0x70   :  { %1059 = vmatpush.bf16.msra.mxu0 %v2071_v36 }
  0x71   :  { %1072 = vmatpush.bf16.msra.mxu1 %v2079_v37 }
  0x72   :  { %1085 = vmatpush.bf16.msra.mxu2 %v2087_v38  ;;  %v1910_v38 = vld [vmem:[#allocation10 + $0x20] sm:$0xf] }
  0x73   :  { %1098 = vmatpush.bf16.msra.mxu3 %v2095_v39  ;;  %v2153_v39 = vld [vmem:[#allocation10 + $0x24] sm:$0xf0] }
  0x74   :  { %1060 = vmatpush.bf16.msra.mxu0 %v2070_v40  ;;  %v2152_v40 = vld [vmem:[#allocation10 + $0x24] sm:$0xf] }
  0x75   :  { %1073 = vmatpush.bf16.msra.mxu1 %v2078_v41  ;;  %v1911_v41 = vor.u32 %v2153_v39, %v1910_v38  ;;  %v2186_v38 = vld [vmem:[#allocation13 + $0x30] sm:$0xff]  ;;  %v2185_v39 = vld [vmem:[#allocation13 + $0x28] sm:$0xff] }
  0x76   :  { %1086 = vmatpush.bf16.msra.mxu2 %v2086_v42  ;;  %v1912_v42 = vld [vmem:[#allocation10 + $0x28] sm:$0xf0] }
  0x77   :  { %1099 = vmatpush.bf16.msra.mxu3 %v2094_v43  ;;  %v1915_v43 = vor.u32 %v2152_v40, %v1912_v42  ;;  %v2184_v40 = vld [vmem:[#allocation13 + $0x20] sm:$0xff]  ;;  %v1130_v42 = vld [vmem:[%s2523_s7 + $0x1] sm:$0x3] }
  0x78   :  { %1061 = vmatpush.bf16.msra.mxu0 %v2069_v44 }
  0x79   :  { %1074 = vmatpush.bf16.msra.mxu1 %v2077_v45  ;;  %v1902_v45 = vld [vmem:[#allocation10 + $0x10] sm:$0xf] }
  0x7a   :  { %1087 = vmatpush.bf16.msra.mxu2 %v2085_v47  ;;  %v2150_v47 = vld [vmem:[#allocation10 + $0x14] sm:$0xf]  ;;  %v1903_v49 = vor.u32 %v2151_v46, %v1902_v45  ;;  %v1133_v45 = vperm.slane %v1130_v42, 1 }
  0x7b   :  { %1100 = vmatpush.bf16.msra.mxu3 %v2093_v48 }
  0x7c   :  { %1062 = vmatpush.bf16.msra.mxu0 %v2068_v52  ;;  %v1907_v52 = vor.u32 %v2150_v47, %v1904_v50 }
  0x7d   :  { %1075 = vmatpush.bf16.msra.mxu1 %v2076_v53 }
  0x7e   :  { %1088 = vmatpush.bf16.msra.mxu2 %v2084_v56  ;;  %v1894_v56 = vld [vmem:[#allocation10] sm:$0xf] }
  0x7f   :  { %1101 = vmatpush.bf16.msra.mxu3 %v2092_v57  ;;  %1063 = vmatmul.bf16.vlgmr.msra.gmra.mxu0 %v731_v58  ;;  %v2149_v57 = vld [vmem:[#allocation10 + $0x4] sm:$0xf0]  ;;  %v2148_v58 = vld [vmem:[#allocation10 + $0x4] sm:$0xf] }
  0x80   :  { %1076 = vmatmul.bf16.vlgmr.msra.gmra.mxu1 %v732_v59  ;;  %1216 = vmatpush.bf16.msrb.mxu0 %v1951_v6  ;;  %v1895_v59 = vor.u32 %v2149_v57, %v1894_v56  ;;  %v2178_v6 = vld [vmem:[#allocation11 + $0x70] sm:$0xff]  ;;  %v2181_v56 = vld [vmem:[#allocation13 + $0x8] sm:$0xff]  ;;  %v2180_v57 = vld [vmem:[#allocation13] sm:$0xff] }
  0x81   :  { %1089 = vmatmul.bf16.vlgmr.msra.gmra.mxu2 %v733_v60  ;;  %1229 = vmatpush.bf16.msrb.mxu1 %v1955_v9  ;;  %v1896_v60 = vld [vmem:[#allocation10 + $0x8] sm:$0xf0] }
  0x82   :  { %1102 = vmatmul.bf16.vlgmr.msra.gmra.mxu3 %v734_v61  ;;  %v1899_v61 = vor.u32 %v2148_v58, %v1896_v60  ;;  %1378 = vmatpush.bf16.msrb.mxu2 %v2171_v3  ;;  %v2177_v9 = vld [vmem:[#allocation11 + $0x68] sm:$0xff]  ;;  %v2201_v58 = vld [vmem:[%s2523_s7 + $0x3] ss:$0 sm:$0xff] }
  0x83   :  { %1391 = vmatpush.bf16.msrb.mxu3 %v2179_v4 }
  0x84   :  { %1217 = vmatpush.bf16.msrb.mxu0 %v1943_v13 }
  0x85   :  { %1230 = vmatpush.bf16.msrb.mxu1 %v1947_v18  ;;  %v2166_v18 = vld [vmem:[#allocation11 + $0x10] sm:$0xff] }
  0x87   :  { %1392 = vmatpush.bf16.msrb.mxu3 %v2178_v6 }
  0x88   :  { %1218 = vmatpush.bf16.msrb.mxu0 %v1935_v22 }
  0x89   :  { %1231 = vmatpush.bf16.msrb.mxu1 %v1939_v23 }
  0x8b   :  { %1393 = vmatpush.bf16.msrb.mxu3 %v2177_v9 }
  0x8c   :  { %1219 = vmatpush.bf16.msrb.mxu0 %v1927_v28 }
  0x8d   :  { %1232 = vmatpush.bf16.msrb.mxu1 %v1931_v29 }
  0x90   :  { %1220 = vmatpush.bf16.msrb.mxu0 %v1919_v33  ;;  %v2165_v33 = vld [vmem:[#allocation11 + $0x8] sm:$0xff] }
  0x91   :  { %1233 = vmatpush.bf16.msrb.mxu1 %v1923_v35  ;;  %v2164_v35 = vld [vmem:[#allocation11] sm:$0xff] }
  0x94   :  { %1221 = vmatpush.bf16.msrb.mxu0 %v1911_v41  ;;  %v2183_v41 = vld [vmem:[#allocation13 + $0x18] sm:$0xff] }
  0x95   :  { %1234 = vmatpush.bf16.msrb.mxu1 %v1915_v43  ;;  %v2182_v43 = vld [vmem:[#allocation13 + $0x10] sm:$0xff] }
  0x98   :  { %1222 = vmatpush.bf16.msrb.mxu0 %v1903_v49 }
  0x99   :  { %1235 = vmatpush.bf16.msrb.mxu1 %v1907_v52 }
  0x9c   :  { %1223 = vmatpush.bf16.msrb.mxu0 %v1895_v59 }
  0x9d   :  { %1236 = vmatpush.bf16.msrb.mxu1 %v1899_v61 }
  0xbc   :  { %v651_v62 = vpop.f32.mrf.mxu0 }
  0xbd   :  { %v664_v63 = vpop.f32.mrf.mxu1 }
  0xbe   :  { %v665_v44 = vadd.f32 %v664_v63, %v651_v62 }
  0xc4   :  { %v2495_v0 = vpop.f32.mrf.mxu2  ;;  %v653_v5 = vpop.f32.mrf.mxu0 }
  0xc5   :  { %v2497_v1 = vpop.f32.mrf.mxu3  ;;  %v666_v8 = vpop.f32.mrf.mxu1  ;;  %v678_v54 = vadd.f32 %v2495_v0, %v665_v44  ;;  %v2170_v0 = vld [vmem:[#allocation11 + $0x30] sm:$0xff]  ;;  %v1132_v44 = vperm.slane %v1130_v42, 0 }
  0xc6   :  { %1379 = vmatpush.bf16.msrb.mxu2 %v2170_v0  ;;  %v2169_v8 = vld [vmem:[#allocation11 + $0x28] sm:$0xff] }
  0xc7   :  { %v691_v62 = vadd.f32 %v2497_v1, %v678_v54  ;;  %v2176_v1 = vld [vmem:[#allocation11 + $0x60] sm:$0xff] }
  0xc8   :  { %1394 = vmatpush.bf16.msrb.mxu3 %v2176_v1 }
  0xca   :  { %1380 = vmatpush.bf16.msrb.mxu2 %v2169_v8 }
  0xcc   :  { %v679_v17 = vpop.f32.mrf.mxu2  ;;  %1395 = vmatpush.bf16.msrb.mxu3 %v2175_v16 }
  0xcd   :  { %v692_v21 = vpop.f32.mrf.mxu3 }
  0xce   :  { %1381 = vmatpush.bf16.msrb.mxu2 %v2168_v11 }
  0xd0   :  { %1396 = vmatpush.bf16.msrb.mxu3 %v2174_v19 }
  0xd2   :  { %1382 = vmatpush.bf16.msrb.mxu2 %v2167_v15 }
  0xd4   :  { %1397 = vmatpush.bf16.msrb.mxu3 %v2173_v34 }
  0xd6   :  { %1383 = vmatpush.bf16.msrb.mxu2 %v2166_v18 }
  0xda   :  { %1384 = vmatpush.bf16.msrb.mxu2 %v2165_v33 }
  0xdc   :  { %v703_v36 = vpop.f32.mrf.mxu0 }
  0xdd   :  { %v716_v37 = vpop.f32.mrf.mxu1  ;;  %v704_v5 = vadd.f32 %v703_v36, %v691_v62  ;;  %v2172_v36 = vld [vmem:[#allocation11 + $0x40] sm:$0xff] }
  0xde   :  { %1385 = vmatpush.bf16.msrb.mxu2 %v2164_v35  ;;  %1398 = vmatpush.bf16.msrb.mxu3 %v2172_v36 }
  0xdf   :  { %v717_v7 = vadd.f32 %v716_v37, %v704_v5  ;;  %v2187_v37 = vld [vmem:[#allocation13 + $0x38] sm:$0xff]  ;;  %v2202_v5 = vld [vmem:[%s2523_s7 + $0x4] ss:$0 sm:$0xff] }
  0xe0   :  { %1474 = vmatpush.bf16.msra.mxu0 %v2187_v37 }
  0xe4   :  { %v1038_v48 = vpop.f32.mrf.mxu2  ;;  %v705_v53 = vpop.f32.mrf.mxu0  ;;  %1475 = vmatpush.bf16.msra.mxu0 %v2186_v38 }
  0xe5   :  { %v1051_v51 = vpop.f32.mrf.mxu3  ;;  %v718_v55 = vpop.f32.mrf.mxu1  ;;  %v1039_v10 = vadd.f32 %v1038_v48, %v717_v7 }
  0xe7   :  { %v1052_v12 = vadd.f32 %v1051_v51, %v1039_v10 }
  0xe8   :  { %1476 = vmatpush.bf16.msra.mxu0 %v2185_v39 }
  0xec   :  { %v1040_v63 = vpop.f32.mrf.mxu2  ;;  %1477 = vmatpush.bf16.msra.mxu0 %v2184_v40 }
  0xed   :  { %v1053_v2 = vpop.f32.mrf.mxu3 }
  0xf0   :  { %1478 = vmatpush.bf16.msra.mxu0 %v2183_v41 }
  0xf4   :  { %1479 = vmatpush.bf16.msra.mxu0 %v2182_v43 }
  0xf8   :  { %1480 = vmatpush.bf16.msra.mxu0 %v2181_v56 }
  0xfc   :  { %v1064_v13 = vpop.f32.mrf.mxu0  ;;  %1481 = vmatpush.bf16.msra.mxu0 %v2180_v57 }
  0xfd   :  { %v1077_v14 = vpop.f32.mrf.mxu1  ;;  %v1065_v17 = vadd.f32 %v1064_v13, %v1052_v12 }
  0xff   :  { %v1078_v20 = vadd.f32 %v1077_v14, %v1065_v17 }
 0x104   :  { %v1090_v21 = vpop.f32.mrf.mxu2  ;;  %v1066_v25 = vpop.f32.mrf.mxu0 }
 0x105   :  { %v1103_v22 = vpop.f32.mrf.mxu3  ;;  %v1091_v23 = vadd.f32 %v1090_v21, %v1078_v20  ;;  %v1079_v26 = vpop.f32.mrf.mxu1 }
 0x107   :  { %v1104_v27 = vadd.f32 %v1103_v22, %v1091_v23 }
 0x109   :  { %v1111_v28 = vadd.f32 %v2200_v24, %v1104_v27 }
 0x10b   :  { %v1112_v29 = vmax.f32 %v1111_v28, 0.0 }
 0x10c   :  { %v1092_v30 = vpop.f32.mrf.mxu2 }
 0x10d   :  { %v1105_v31 = vpop.f32.mrf.mxu3  ;;  %v1113_v32 = vpack.c.bf16 %v1112_v29, %v1112_v29 }
 0x10f   :  { %1224 = vmatmul.bf16.vlgmr.msrb.gmra.mxu0 %v1113_v32  ;;  %1237 = vmatmul.bf16.vlgmr.msrb.gmra.mxu1 %v1113_v32 }
 0x18c   :  { %v1225_v46 = vpop.f32.mrf.mxu0  ;;  %v1238_v47 = vpop.f32.mrf.mxu1 }
 0x18d   :  { %v1226_v48 = vadd.f32 %v1225_v46, %v1132_v44  ;;  %v1239_v49 = vadd.f32 %v1238_v47, %v1133_v45 }
 0x18f   :  { %v1242_v50 = vmax.f32 %v1226_v48, 0.0  ;;  %v1243_v51 = vmax.f32 %v1239_v49, 0.0 }
 0x191   :  { %v1244_v52 = vpack.c.bf16 %v1242_v50, %v1242_v50  ;;  %v1245_v53 = vpack.c.bf16 %v1243_v51, %v1243_v51 }
 0x193   :  { %1386 = vmatmul.bf16.vlgmr.msrb.gmra.mxu2 %v1244_v52  ;;  %1399 = vmatmul.bf16.vlgmr.msrb.gmra.mxu3 %v1245_v53 }
 0x194   :  { %v1227_v54 = vpop.f32.mrf.mxu0  ;;  %v1240_v55 = vpop.f32.mrf.mxu1 }
 0x216   :  { %v1387_v59 = vpop.f32.mrf.mxu2  ;;  %v1400_v60 = vpop.f32.mrf.mxu3 }
 0x217   :  { %v1388_v61 = vadd.f32 %v2201_v58, %v1387_v59 }
 0x219   :  { %v1401_v62 = vadd.f32 %v1400_v60, %v1388_v61 }
 0x21b   :  { %v1404_v63 = vmax.f32 %v1401_v62, 0.0 }
 0x21d   :  { %v1405_v2 = vpack.c.bf16 %v1404_v63, %v1404_v63 }
 0x21e   :  { %v1389_v3 = vpop.f32.mrf.mxu2  ;;  %v1402_v4 = vpop.f32.mrf.mxu3 }
 0x21f   :  { %1482 = vmatmul.bf16.vlgmr.msra.gmra.mxu0 %v1405_v2 }
 0x29c   :  { %v1483_v0 = vpop.f32.mrf.mxu0 }
 0x29d   :  { %v1484_v6 = vadd.f32 %v2202_v5, %v1483_v0 }
 0x29f   :  { %1487 = vst [vmem:[#allocation14] sm:$0xff] %v1484_v6 }
 0x2a0   :  { %1498 = dma.vmem_to_hbm [thread:$0]  %s1494_s22, 128, %s1496_s24, [#allocation4]  }
 0x2a4   :  { %v1485_v7 = vpop.f32.mrf.mxu0 }
 0x2a5   :  { %2403 = dma.done.wait [#allocation4], 128  }
 0x2a6   :  { %2404 = vsyncadd [#allocation4], 4294967168 }
 0x2a7   :  { %1503 = vsyncpa [#allocation3], 1 }
 0x2a8   :  { %1504 = vsyncpa [#allocation6], 1 }
 0x2a9   :  { %1505 = vsyncpa [#allocation9], 1 }
 0x2aa   :  { %1506 = vsyncpa [#allocation12], 1 }
 0x2ab   :  { %1507 = vsyncpa [#allocation4], 1 }

</bundles_post_ra>
